<compile_context>
chip_gen: v6e
topology: v6e:2x2x1
jax: 0.10.0
libtpu: 0.0.40
codegen_flags: <defaults>
</compile_context>

<pallas_src>
import functools

import jax
import jax.numpy as jnp
from jax.experimental import pallas as pl
from jax.experimental.pallas import tpu as pltpu


def _round_up(n, m):
    return ((n + m - 1) // m) * m


def classifier_kernel(x_ref, w_ref, b_ref, o_ref):
    # x_ref: (tb, K) f32, w_ref: (K, CP) bf16, b_ref: (1, CP) f32,
    # o_ref: (tb, CP) f32.  Padded class columns carry bias = -1e30 (f32), so
    # their exp() is exactly 0 and no explicit mask is needed.
    x = x_ref[...].astype(w_ref.dtype)                       # in-kernel cast
    logits = jnp.dot(x, w_ref[...],
                     preferred_element_type=jnp.float32) + b_ref[...]
    m = jnp.max(logits, axis=1, keepdims=True)               # stable softmax
    e = jnp.exp(logits - m)
    o_ref[...] = e / jnp.sum(e, axis=1, keepdims=True)       # exact normalize


def prepare_classifier_params(w, b, *, weight_dtype=jnp.bfloat16):
    """One-time parameter prep (hoisted out of the per-call forward path).

    Pads the class dim to a lane-dense multiple of 128 and casts the weight
    to the MXU compute dtype.  Padded classes get bias -1e30 so they vanish
    from the softmax.  NOTE: the bias must stay f32 for that trick to hold.
    """
    K, C = w.shape
    CP = _round_up(max(C, 128), 128)
    w_p = jnp.zeros((K, CP), weight_dtype).at[:, :C].set(w.astype(weight_dtype))
    b_p = jnp.full((1, CP), -1e30, jnp.float32).at[0, :C].set(
        b.astype(jnp.float32))
    return w_p, b_p


def _pick_batch_tile(B):
    # Single tile for small batches; otherwise a sublane-friendly divisor so
    # the "parallel" grid axis can shard across TensorCores (v7x).
    if B <= 128:
        return B
    for tb in (256, 128, 64, 32, 16, 8):
        if B % tb == 0:
            return tb
    return B


@functools.partial(jax.jit, static_argnames=("num_classes",))
def classifier_forward(features, w_p, b_p, *, num_classes):
    """features: (B, 2048, ...) feature-extractor output (flattened per row).
    w_p, b_p: outputs of prepare_classifier_params.
    Returns softmax probabilities of shape (B, num_classes)."""
    B = features.shape[0]
    x = features.reshape(B, -1)                  # view-only flatten
    K = x.shape[1]
    CP = w_p.shape[1]
    assert K == w_p.shape[0]
    # Whole padded weight lives in VMEM (double-buffered by the pipeline):
    # keep it comfortably under the 32 MiB default scoped-VMEM limit, which
    # also respects v7x's smaller physical VMEM.
    assert CP * K * w_p.dtype.itemsize <= 8 * 1024 * 1024, (
        "head too large for the single-block path; needs a class-tiled grid")

    tb = _pick_batch_tile(B)
    grid = (B // tb,)

    out_p = pl.pallas_call(
        classifier_kernel,
        out_shape=jax.ShapeDtypeStruct((B, CP), jnp.float32),
        grid=grid,
        in_specs=[
            pl.BlockSpec((tb, K), lambda i: (i, 0)),   # activations (f32)
            pl.BlockSpec((K, CP), lambda i: (0, 0)),   # weight, VMEM-resident
            pl.BlockSpec((1, CP), lambda i: (0, 0)),   # bias (f32)
        ],
        out_specs=pl.BlockSpec((tb, CP), lambda i: (i, 0)),
        compiler_params=pltpu.CompilerParams(
            dimension_semantics=("parallel",)),        # v7x: shard over 2 TCs
    )(x, w_p, b_p)

    return out_p[:, :num_classes]


def reference_forward(features, w, b):
    x = features.reshape(features.shape[0], -1).astype(jnp.float32)
    logits = x @ w.astype(jnp.float32) + b.astype(jnp.float32)
    return jax.nn.softmax(logits, axis=1)


if __name__ == "__main__":
    key = jax.random.PRNGKey(0)
    k_x, k_w, k_b = jax.random.split(key, 3)

    batch = 2
    in_features = 2048       # fixed by nn.Linear(2048, num_classes)
    num_classes = 10

    # Synthetic "feature extractor output" in NCHW: (B, 2048, 1, 1)
    features = jax.random.normal(k_x, (batch, in_features, 1, 1),
                                 dtype=jnp.float32)

    # Deterministic parameter init (uniform, like PyTorch's Linear default)
    bound = 1.0 / (in_features ** 0.5)
    w = jax.random.uniform(k_w, (in_features, num_classes),
                           minval=-bound, maxval=bound, dtype=jnp.float32)
    b = jax.random.uniform(k_b, (num_classes,),
                           minval=-bound, maxval=bound, dtype=jnp.float32)

    # One-time parameter prep -- hoisted out of the per-call path.
    w_p, b_p = prepare_classifier_params(w, b)
    w_p, b_p = jax.block_until_ready((w_p, b_p))

    out = classifier_forward(features, w_p, b_p, num_classes=num_classes)
    out = jax.block_until_ready(out)

    ref = reference_forward(features, w, b)
    assert out.shape == (batch, num_classes)
    # bf16 MXU operands contribute ~1e-3 absolute error on probabilities.
    assert jnp.allclose(out, ref, atol=5e-3, rtol=5e-3)
    # Exact normalization: rows sum to 1 to f32 precision.
    assert jnp.allclose(jnp.sum(out, axis=1), 1.0, atol=1e-4)

    print("KERNEL_OK")
</pallas_src>

<mosaic_0001>
module attributes {stable_mosaic.version = 11 : i64} {
  func.func @classifier_kernel(%arg0: i32, %arg1: memref<2x2048xf32, #tpu.memory_space<vmem>>, %arg2: memref<2048x128xbf16, #tpu.memory_space<vmem>>, %arg3: memref<1x128xf32, #tpu.memory_space<vmem>>, %arg4: memref<2x128xf32, #tpu.memory_space<vmem>>) attributes {dimension_semantics = [#tpu.dimension_semantics<parallel>], iteration_bounds = array<i64: 1>, scalar_prefetch = 0 : i64, scratch_operands = 0 : i64, tpu.core_type = #tpu.core_type<tc>, window_params = [{transform_indices = @transform_0, window_bounds = array<i64: 2, 2048>}, {pipeline_mode = #tpu.pipeline_mode<synchronous>, transform_indices = @transform_1, window_bounds = array<i64: 2048, 128>}, {pipeline_mode = #tpu.pipeline_mode<synchronous>, transform_indices = @transform_2, window_bounds = array<i64: 1, 128>}, {transform_indices = @transform_3, window_bounds = array<i64: 2, 128>}]} {
    %c0 = arith.constant 0 : index
    %c0_0 = arith.constant 0 : index
    %0 = vector.load %arg1[%c0, %c0_0] : memref<2x2048xf32, #tpu.memory_space<vmem>>, vector<2x2048xf32>
    %1 = arith.truncf %0 : vector<2x2048xf32> to vector<2x2048xbf16>
    %c0_1 = arith.constant 0 : index
    %c0_2 = arith.constant 0 : index
    %2 = vector.load %arg2[%c0_1, %c0_2] : memref<2048x128xbf16, #tpu.memory_space<vmem>>, vector<2048x128xbf16>
    %cst = arith.constant dense<0.000000e+00> : vector<2x128xf32>
    %3 = tpu.matmul %1, %2, %cst {dimension_numbers = #tpu.dot_dimension_numbers<[1], [0], [0], [1], [0, 0, 1, 1], [], []>} : vector<2x2048xbf16>, vector<2048x128xbf16>, vector<2x128xf32> -> vector<2x128xf32>
    %c0_3 = arith.constant 0 : index
    %c0_4 = arith.constant 0 : index
    %4 = vector.load %arg3[%c0_3, %c0_4] : memref<1x128xf32, #tpu.memory_space<vmem>>, vector<1x128xf32>
    %5 = vector.broadcast %4 : vector<1x128xf32> to vector<2x128xf32>
    %6 = arith.addf %3, %5 : vector<2x128xf32>
    %cst_5 = arith.constant dense<0xFF800000> : vector<2xf32>
    %7 = vector.multi_reduction <maximumf>, %6, %cst_5 [1] : vector<2x128xf32> to vector<2xf32>
    %8 = vector.shape_cast %7 : vector<2xf32> to vector<2x1xf32>
    %9 = vector.broadcast %8 : vector<2x1xf32> to vector<2x128xf32>
    %10 = arith.subf %6, %9 : vector<2x128xf32>
    %11 = math.exp %10 : vector<2x128xf32>
    %cst_6 = arith.constant dense<0.000000e+00> : vector<2xf32>
    %12 = vector.multi_reduction <add>, %11, %cst_6 [1] : vector<2x128xf32> to vector<2xf32>
    %13 = vector.shape_cast %12 : vector<2xf32> to vector<2x1xf32>
    %14 = vector.broadcast %13 : vector<2x1xf32> to vector<2x128xf32>
    %15 = arith.divf %11, %14 : vector<2x128xf32>
    %c0_7 = arith.constant 0 : index
    %c0_8 = arith.constant 0 : index
    %16 = vector.load %arg4[%c0_7, %c0_8] : memref<2x128xf32, #tpu.memory_space<vmem>>, vector<2x128xf32>
    tpu.vector_store %arg4[%c0_7, %c0_8], %15 {strides = array<i32>} : memref<2x128xf32, #tpu.memory_space<vmem>>, vector<2x128xf32>,
    return
  }
  func.func @transform_0(%arg0: i32) -> (i32, i32) {
    %c0_i32 = arith.constant 0 : i32
    %c0_i32_0 = arith.constant 0 : i32
    return %arg0, %c0_i32 : i32, i32
  }
  func.func @transform_1(%arg0: i32) -> (i32, i32) {
    %c0_i32 = arith.constant 0 : i32
    %c0_i32_0 = arith.constant 0 : i32
    %c0_i32_1 = arith.constant 0 : i32
    return %c0_i32, %c0_i32_0 : i32, i32
  }
  func.func @transform_2(%arg0: i32) -> (i32, i32) {
    %c0_i32 = arith.constant 0 : i32
    %c0_i32_0 = arith.constant 0 : i32
    %c0_i32_1 = arith.constant 0 : i32
    return %c0_i32, %c0_i32_0 : i32, i32
  }
  func.func @transform_3(%arg0: i32) -> (i32, i32) {
    %c0_i32 = arith.constant 0 : i32
    %c0_i32_0 = arith.constant 0 : i32
    return %arg0, %c0_i32 : i32, i32
  }
}

</mosaic_0001>

<bundles_post_ra>
// kernel: classifier_forward.1
= control target key start
LH: loop header
LB: loop body
LE: loop exit
PB: predicated region body
PF: predicated region fallthrough
CT: control target
= control target key end

     0   :  { %8 = vsyncpa [#allocation3], 0  ;;  %s2063_s0 = inlined_call_operand.vmem [shape: f32[2,2048], index: 0, kind: input, shape index: {}]   ;;  %s2064_s1 = inlined_call_operand.hbm [shape: bf16[2048,128], index: 1, kind: input, shape index: {}]   ;;  %s2065_s2 = inlined_call_operand.vmem [shape: f32[1,128], index: 2, kind: input, shape index: {}]   ;;  %s2066_s3 = inlined_call_operand.hbm [shape: f32[2,128], index: 3, kind: output, shape index: {}]  }
   0x1   :  { %9 = vsyncpa [#allocation4], 0  ;;  %s2007_s12 = smov [#allocation2]  }
   0x2   :  { %s17_s13 = sshll.u32 %s2007_s12, 4  ;;  %s18_s13 = int_to_ptr.vmem [resolvable:$true] %s17_s13 }
   0x3   :  { %s1971_s14 = scalar_lea.vmem %s18_s13, 16384  ;;  %p1976_p1 = scmp.lt.s32.totalorder %s18_s13, %s18_s13 }
   0x4   :  { %p1972_p0 = scmp.ne.s32.totalorder %s18_s13, %s1971_s14  ;;  %p1977_p2 = scmp.lt.s32.totalorder %s1971_s14, %s1971_s14 }
   0x6   :  { %p1978_p3 = por %p1977_p2, %p1976_p1 }
   0x8   :  { %p1979_p4 = pnand %p1978_p3, %p1972_p0 }
   0xa   :  { %1982 = shalt.err (!%p1979_p4)
}
   0xb   :  { %s2008_s15 = smov 64   ;;  %s2009_s16 = smov 4  }
   0xc   :  { %23 = dma.hbm_to_vmem [thread:$0]  %s2064_s1, 16384, %s18_s13, [#allocation3], %s2008_s15, %s2008_s15, %s2009_s16  }
   0xd   :  { %2003 = dma.done.wait [#allocation3], 16384  }
   0xe   :  { %2004 = vsyncadd [#allocation3], 4294950912  ;;  %v1827_v0 = vld [vmem:[#allocation2 + $0x78] sm:$0xff]   ;;  %v1831_v4 = vld [vmem:[#allocation2 + $0x70] sm:$0xff]   ;;  %v2010_v22 = vmov 1983009808   ;;  %v42_v24 = vlaneseq }
   0xf   :  { %v1828_v1 = vld [vmem:[#allocation2 + $0xf8] sm:$0xff]   ;;  %1646 = vmatprep.subr.bf16.mxu0 %v1827_v0  ;;  %v1832_v5 = vld [vmem:[#allocation2 + $0xf0] sm:$0xff]   ;;  %v1835_v8 = vld [vmem:[#allocation2 + $0x68] sm:$0xff]   ;;  %v40_v23 = vunpack.c.l.s4 %v2010_v22  ;;  %vm1489_vm0 = vcmask 1041408  }
  0x10   :  { %v1829_v2 = vld [vmem:[#allocation2 + $0x38] sm:$0xff]   ;;  %1668 = vmatprep.subr.bf16.mxu1 %v1828_v1  ;;  %v1833_v6 = vld [vmem:[#allocation2 + $0x30] sm:$0xff]   ;;  %v1836_v9 = vld [vmem:[#allocation2 + $0xe8] sm:$0xff]   ;;  %v43_v30 = vshrl.u32 %v42_v24, 7 }
  0x11   :  { %v1830_v3 = vld [vmem:[#allocation2 + $0xb8] sm:$0xff]   ;;  %1647 = vmatpush3.bf16.msra.mxu0 %v1829_v2  ;;  %v1834_v7 = vld [vmem:[#allocation2 + $0xb0] sm:$0xff]   ;;  %v1837_v10 = vld [vmem:[#allocation2 + $0x28] sm:$0xff]   ;;  %v41_v29 = vunpack.c.0.s8 %v40_v23 }
  0x12   :  { %1669 = vmatpush3.bf16.msra.mxu1 %v1830_v3  ;;  %1648 = vmatprep.subr.bf16.mxu0 %v1831_v4  ;;  %v1838_v11 = vld [vmem:[#allocation2 + $0xa8] sm:$0xff]   ;;  %v1839_v12 = vld [vmem:[#allocation2 + $0x60] sm:$0xff]   ;;  %v1843_v16 = vld [vmem:[#allocation2 + $0x58] sm:$0xff]  }
  0x13   :  { %1670 = vmatprep.subr.bf16.mxu1 %v1832_v5  ;;  %v1840_v13 = vld [vmem:[#allocation2 + $0xe0] sm:$0xff]   ;;  %v1844_v17 = vld [vmem:[#allocation2 + $0xd8] sm:$0xff]   ;;  %v1847_v20 = vld [vmem:[#allocation2 + $0x50] sm:$0xff]   ;;  %v2035_v35 = vsub.s32 %v41_v29, %v43_v30 }
  0x14   :  { %v1841_v14 = vld [vmem:[#allocation2 + $0x20] sm:$0xff]   ;;  %v1845_v18 = vld [vmem:[#allocation2 + $0x18] sm:$0xff]   ;;  %v1848_v21 = vld [vmem:[#allocation2 + $0xd0] sm:$0xff]  }
  0x15   :  { %1649 = vmatpush3.bf16.msra.mxu0 %v1833_v6  ;;  %v1842_v15 = vld [vmem:[#allocation2 + $0xa0] sm:$0xff]   ;;  %v1846_v19 = vld [vmem:[#allocation2 + $0x98] sm:$0xff]   ;;  %v1849_v25 = vld [vmem:[#allocation2 + $0x10] sm:$0xff]  }
  0x16   :  { %1671 = vmatpush3.bf16.msra.mxu1 %v1834_v7  ;;  %1650 = vmatprep.subr.bf16.mxu0 %v1835_v8  ;;  %v1850_v26 = vld [vmem:[#allocation2 + $0x90] sm:$0xff]   ;;  %v1851_v27 = vld [vmem:[#allocation2 + $0x48] sm:$0xff]   ;;  %v1855_v33 = vld [vmem:[#allocation2 + $0x40] sm:$0xff]  }
  0x17   :  { %1672 = vmatprep.subr.bf16.mxu1 %v1836_v9  ;;  %v1852_v28 = vld [vmem:[#allocation2 + $0xc8] sm:$0xff]   ;;  %v1856_v34 = vld [vmem:[#allocation2 + $0xc0] sm:$0xff]   ;;  %v1860_v41 = vld [vmem:[#allocation2 + $0x178] sm:$0xff]  }
  0x18   :  { %v1853_v31 = vld [vmem:[#allocation2 + $0x8] sm:$0xff]   ;;  %v1857_v36 = vld [vmem:[#allocation2] sm:$0xff]   ;;  %v1861_v42 = vld [vmem:[#allocation2 + $0x1f8] sm:$0xff]  }
  0x19   :  { %1651 = vmatpush3.bf16.msra.mxu0 %v1837_v10  ;;  %v1854_v32 = vld [vmem:[#allocation2 + $0x88] sm:$0xff]   ;;  %v1858_v37 = vld [vmem:[#allocation2 + $0x80] sm:$0xff]   ;;  %v1862_v48 = vld [vmem:[#allocation2 + $0x138] sm:$0xff]  }
  0x1a   :  { %1673 = vmatpush3.bf16.msra.mxu1 %v1838_v11  ;;  %1652 = vmatprep.subr.bf16.mxu0 %v1839_v12  ;;  %v30_v38 = vld [vmem:[%s2063_s0] sm:$0xff]  ;;  %v1864_v50 = vld [vmem:[#allocation2 + $0x170] sm:$0xff]   ;;  %v1863_v52 = vld [vmem:[#allocation2 + $0x1b8] sm:$0xff]  }
  0x1b   :  { %1674 = vmatprep.subr.bf16.mxu1 %v1840_v13  ;;  %v45_v39 = vrot.slane %v30_v38, %v2035_v35  ;;  %v38_v40 = vcombine.high %v30_v38, %v30_v38  ;;  %v1865_v53 = vld [vmem:[#allocation2 + $0x1f0] sm:$0xff]   ;;  %v1868_v55 = vld [vmem:[#allocation2 + $0x168] sm:$0xff]   ;;  %v1872_v59 = vld [vmem:[#allocation2 + $0x160] sm:$0xff]  }
  0x1c   :  { %v1866_v54 = vld [vmem:[#allocation2 + $0x130] sm:$0xff]   ;;  %v1869_v57 = vld [vmem:[#allocation2 + $0x1e8] sm:$0xff]   ;;  %v1873_v61 = vld [vmem:[#allocation2 + $0x1e0] sm:$0xff]  }
  0x1d   :  { %1653 = vmatpush3.bf16.msra.mxu0 %v1841_v14  ;;  %v53_v43 = vcombine.high %v45_v39, %v45_v39  ;;  %v52_v44 = vrot.slane %v38_v40, %v2035_v35  ;;  %v122_v45 = vpack.c.bf16 %v45_v39, %v45_v39  ;;  %v1867_v56 = vld [vmem:[#allocation2 + $0x1b0] sm:$0xff]   ;;  %v1870_v58 = vld [vmem:[#allocation2 + $0x128] sm:$0xff]   ;;  %v1874_v62 = vld [vmem:[#allocation2 + $0x120] sm:$0xff]  }
  0x1e   :  { %1675 = vmatpush3.bf16.msra.mxu1 %v1842_v15  ;;  %1654 = vmatprep.subr.bf16.mxu0 %v1843_v16  ;;  %v1871_v60 = vld [vmem:[#allocation2 + $0x1a8] sm:$0xff]   ;;  %v1876_v63 = vld [vmem:[#allocation2 + $0x158] sm:$0xff]   ;;  %v1875_v0 = vld [vmem:[#allocation2 + $0x1a0] sm:$0xff]  }
  0x1f   :  { %1676 = vmatprep.subr.bf16.mxu1 %v1844_v17  ;;  %v123_v46 = vpack.c.bf16 %v53_v43, %v53_v43  ;;  %v54_v47 = vcombine.high %v52_v44, %v52_v44  ;;  %v124_v49 = vpack.c.bf16 %v52_v44, %v52_v44  ;;  %v1877_v1 = vld [vmem:[#allocation2 + $0x1d8] sm:$0xff]   ;;  %v1880_v3 = vld [vmem:[#allocation2 + $0x150] sm:$0xff]   ;;  %v1884_v7 = vld [vmem:[#allocation2 + $0x148] sm:$0xff]  }
  0x20   :  { %v1878_v2 = vld [vmem:[#allocation2 + $0x118] sm:$0xff]   ;;  %v1881_v5 = vld [vmem:[#allocation2 + $0x1d0] sm:$0xff]   ;;  %v1885_v9 = vld [vmem:[#allocation2 + $0x1c8] sm:$0xff]  }
  0x21   :  { %1655 = vmatpush3.bf16.msra.mxu0 %v1845_v18  ;;  %1201 = vmatprep.mubr.bf16.mxu0 %v123_v46  ;;  %v125_v51 = vpack.c.bf16 %v54_v47, %v54_v47  ;;  %v1879_v4 = vld [vmem:[#allocation2 + $0x198] sm:$0xff]   ;;  %v1882_v6 = vld [vmem:[#allocation2 + $0x110] sm:$0xff]   ;;  %v1886_v10 = vld [vmem:[#allocation2 + $0x108] sm:$0xff]  }
  0x22   :  { %1677 = vmatpush3.bf16.msra.mxu1 %v1846_v19  ;;  %1656 = vmatprep.subr.bf16.mxu0 %v1847_v20  ;;  %v1883_v8 = vld [vmem:[#allocation2 + $0x190] sm:$0xff]   ;;  %v1888_v11 = vld [vmem:[#allocation2 + $0x140] sm:$0xff]   ;;  %v1887_v12 = vld [vmem:[#allocation2 + $0x188] sm:$0xff]  }
  0x23   :  { %1678 = vmatprep.subr.bf16.mxu1 %v1848_v21  ;;  %1241 = vmatprep.mubr.bf16.mxu1 %v125_v51  ;;  %v1889_v13 = vld [vmem:[#allocation2 + $0x1c0] sm:$0xff]   ;;  %v31_v14 = vld [vmem:[%s2063_s0 + $0x8] sm:$0xff]  ;;  %v1893_v18 = vld [vmem:[#allocation2 + $0x278] sm:$0xff]  }
  0x24   :  { %v1890_v15 = vld [vmem:[#allocation2 + $0x100] sm:$0xff]   ;;  %v62_v16 = vrot.slane %v31_v14, %v2035_v35  ;;  %v55_v17 = vcombine.high %v31_v14, %v31_v14  ;;  %v1894_v23 = vld [vmem:[#allocation2 + $0x2f8] sm:$0xff]   ;;  %v1904_v39 = vld [vmem:[#allocation2 + $0x2a8] sm:$0xff]  }
  0x25   :  { %1657 = vmatpush3.bf16.msra.mxu0 %v1849_v25  ;;  %v1891_v19 = vld [vmem:[#allocation2 + $0x180] sm:$0xff]   ;;  %v1896_v30 = vld [vmem:[#allocation2 + $0x2b8] sm:$0xff]   ;;  %v1913_v46 = vld [vmem:[#allocation2 + $0x250] sm:$0xff]  }
  0x26   :  { %1679 = vmatpush3.bf16.msra.mxu1 %v1850_v26  ;;  %1658 = vmatprep.subr.bf16.mxu0 %v1851_v27  ;;  %v70_v20 = vcombine.high %v62_v16, %v62_v16  ;;  %v69_v21 = vrot.slane %v55_v17, %v2035_v35  ;;  %v126_v22 = vpack.c.bf16 %v62_v16, %v62_v16  ;;  %v1895_v26 = vld [vmem:[#allocation2 + $0x238] sm:$0xff]   ;;  %v1905_v38 = vld [vmem:[#allocation2 + $0x260] sm:$0xff]   ;;  %v1916_v51 = vld [vmem:[#allocation2 + $0x290] sm:$0xff]  }
  0x27   :  { %1680 = vmatprep.subr.bf16.mxu1 %v1852_v28  ;;  %v1897_v28 = vld [vmem:[#allocation2 + $0x270] sm:$0xff]   ;;  %v1906_v40 = vld [vmem:[#allocation2 + $0x2e0] sm:$0xff]   ;;  %v1910_v44 = vld [vmem:[#allocation2 + $0x2d8] sm:$0xff]  }
  0x28   :  { %v127_v24 = vpack.c.bf16 %v70_v20, %v70_v20  ;;  %v71_v25 = vcombine.high %v69_v21, %v69_v21  ;;  %v128_v27 = vpack.c.bf16 %v69_v21, %v69_v21  ;;  %v1908_v43 = vld [vmem:[#allocation2 + $0x2a0] sm:$0xff]   ;;  %v1912_v47 = vld [vmem:[#allocation2 + $0x298] sm:$0xff]   ;;  %v1935_v14 = vld [vmem:[#allocation2 + $0x3e8] sm:$0xff]  }
  0x29   :  { %1659 = vmatpush3.bf16.msra.mxu0 %v1853_v31  ;;  %v1898_v31 = vld [vmem:[#allocation2 + $0x2f0] sm:$0xff]   ;;  %v1938_v16 = vld [vmem:[#allocation2 + $0x360] sm:$0xff]   ;;  %v1937_v17 = vld [vmem:[#allocation2 + $0x3a8] sm:$0xff]  }
  0x2a   :  { %1681 = vmatpush3.bf16.msra.mxu1 %v1854_v32  ;;  %1660 = vmatprep.subr.bf16.mxu0 %v1855_v33  ;;  %v129_v29 = vpack.c.bf16 %v71_v25, %v71_v25  ;;  %v1899_v32 = vld [vmem:[#allocation2 + $0x230] sm:$0xff]   ;;  %v1901_v33 = vld [vmem:[#allocation2 + $0x268] sm:$0xff]   ;;  %v1942_v20 = vld [vmem:[#allocation2 + $0x358] sm:$0xff]  }
  0x2b   :  { %1682 = vmatprep.subr.bf16.mxu1 %v1856_v34  ;;  %v1900_v34 = vld [vmem:[#allocation2 + $0x2b0] sm:$0xff]   ;;  %v1941_v21 = vld [vmem:[#allocation2 + $0x3a0] sm:$0xff]   ;;  %v1945_v25 = vld [vmem:[#allocation2 + $0x398] sm:$0xff]  }
  0x2d   :  { %1661 = vmatpush3.bf16.msra.mxu0 %v1857_v36  ;;  %v1902_v36 = vld [vmem:[#allocation2 + $0x2e8] sm:$0xff]  }
  0x2e   :  { %1683 = vmatpush3.bf16.msra.mxu1 %v1858_v37  ;;  %1690 = vmatprep.subr.bf16.mxu0 %v1860_v41  ;;  %v1903_v37 = vld [vmem:[#allocation2 + $0x228] sm:$0xff]   ;;  %v1907_v41 = vld [vmem:[#allocation2 + $0x220] sm:$0xff]  }
  0x2f   :  { %1712 = vmatprep.subr.bf16.mxu1 %v1861_v42  ;;  %v1909_v42 = vld [vmem:[#allocation2 + $0x258] sm:$0xff]  }
  0x30   :  { %1202 = vmatmul.mubr.bf16.vlgmr.msra.gmra.mxu0 %v122_v45  ;;  %v1911_v45 = vld [vmem:[#allocation2 + $0x218] sm:$0xff]  }
  0x31   :  { %1691 = vmatpush3.bf16.msra.mxu0 %v1862_v48  ;;  %1242 = vmatmul.mubr.bf16.vlgmr.msra.gmra.mxu1 %v124_v49  ;;  %v1914_v48 = vld [vmem:[#allocation2 + $0x2d0] sm:$0xff]  }
  0x32   :  { %1692 = vmatprep.subr.bf16.mxu0 %v1864_v50  ;;  %1713 = vmatpush3.bf16.msra.mxu1 %v1863_v52  ;;  %v1915_v49 = vld [vmem:[#allocation2 + $0x210] sm:$0xff]   ;;  %v1917_v50 = vld [vmem:[#allocation2 + $0x248] sm:$0xff]  }
  0x33   :  { %1714 = vmatprep.subr.bf16.mxu1 %v1865_v53  ;;  %1281 = vmatprep.mubr.bf16.mxu0 %v127_v24  ;;  %v1918_v52 = vld [vmem:[#allocation2 + $0x2c8] sm:$0xff]   ;;  %v1946_v24 = vld [vmem:[#allocation2 + $0x350] sm:$0xff]  }
  0x34   :  { %1321 = vmatprep.mubr.bf16.mxu1 %v129_v29  ;;  %v1919_v53 = vld [vmem:[#allocation2 + $0x208] sm:$0xff]   ;;  %v1949_v29 = vld [vmem:[#allocation2 + $0x390] sm:$0xff]  }
  0x35   :  { %1693 = vmatpush3.bf16.msra.mxu0 %v1866_v54  ;;  %v1921_v54 = vld [vmem:[#allocation2 + $0x240] sm:$0xff]  }
  0x36   :  { %1694 = vmatprep.subr.bf16.mxu0 %v1868_v55  ;;  %1715 = vmatpush3.bf16.msra.mxu1 %v1867_v56  ;;  %v1920_v55 = vld [vmem:[#allocation2 + $0x288] sm:$0xff]   ;;  %v1922_v56 = vld [vmem:[#allocation2 + $0x2c0] sm:$0xff]  }
  0x37   :  { %1716 = vmatprep.subr.bf16.mxu1 %v1869_v57  ;;  %v32_v57 = vld [vmem:[%s2063_s0 + $0x10] sm:$0xff] }
  0x39   :  { %1695 = vmatpush3.bf16.msra.mxu0 %v1870_v58  ;;  %v1923_v58 = vld [vmem:[#allocation2 + $0x200] sm:$0xff]  }
  0x3a   :  { %1696 = vmatprep.subr.bf16.mxu0 %v1872_v59  ;;  %1717 = vmatpush3.bf16.msra.mxu1 %v1871_v60  ;;  %v79_v59 = vrot.slane %v32_v57, %v2035_v35  ;;  %v72_v60 = vcombine.high %v32_v57, %v32_v57 }
  0x3b   :  { %1718 = vmatprep.subr.bf16.mxu1 %v1873_v61  ;;  %v1926_v61 = vld [vmem:[#allocation2 + $0x378] sm:$0xff]  }
  0x3d   :  { %1697 = vmatpush3.bf16.msra.mxu0 %v1874_v62  ;;  %v1924_v62 = vld [vmem:[#allocation2 + $0x280] sm:$0xff]  }
  0x3e   :  { %1698 = vmatprep.subr.bf16.mxu0 %v1876_v63  ;;  %1719 = vmatpush3.bf16.msra.mxu1 %v1875_v0  ;;  %v87_v63 = vcombine.high %v79_v59, %v79_v59  ;;  %v86_v0 = vrot.slane %v72_v60, %v2035_v35 }
  0x3f   :  { %1720 = vmatprep.subr.bf16.mxu1 %v1877_v1  ;;  %v130_v1 = vpack.c.bf16 %v79_v59, %v79_v59 }
  0x41   :  { %1699 = vmatpush3.bf16.msra.mxu0 %v1878_v2  ;;  %v1927_v2 = vld [vmem:[#allocation2 + $0x3f8] sm:$0xff]  }
  0x42   :  { %1700 = vmatprep.subr.bf16.mxu0 %v1880_v3  ;;  %1721 = vmatpush3.bf16.msra.mxu1 %v1879_v4  ;;  %v131_v3 = vpack.c.bf16 %v87_v63, %v87_v63  ;;  %v88_v4 = vcombine.high %v86_v0, %v86_v0 }
  0x43   :  { %1722 = vmatprep.subr.bf16.mxu1 %v1881_v5  ;;  %v1928_v5 = vld [vmem:[#allocation2 + $0x338] sm:$0xff]  }
  0x45   :  { %1701 = vmatpush3.bf16.msra.mxu0 %v1882_v6  ;;  %v132_v6 = vpack.c.bf16 %v86_v0, %v86_v0 }
  0x46   :  { %1702 = vmatprep.subr.bf16.mxu0 %v1884_v7  ;;  %1723 = vmatpush3.bf16.msra.mxu1 %v1883_v8  ;;  %v1930_v7 = vld [vmem:[#allocation2 + $0x370] sm:$0xff]   ;;  %v133_v8 = vpack.c.bf16 %v88_v4, %v88_v4 }
  0x47   :  { %1724 = vmatprep.subr.bf16.mxu1 %v1885_v9  ;;  %v1929_v9 = vld [vmem:[#allocation2 + $0x3b8] sm:$0xff]  }
  0x49   :  { %1703 = vmatpush3.bf16.msra.mxu0 %v1886_v10  ;;  %v1931_v10 = vld [vmem:[#allocation2 + $0x3f0] sm:$0xff]  }
  0x4a   :  { %1704 = vmatprep.subr.bf16.mxu0 %v1888_v11  ;;  %1725 = vmatpush3.bf16.msra.mxu1 %v1887_v12  ;;  %v1932_v11 = vld [vmem:[#allocation2 + $0x330] sm:$0xff]   ;;  %v1934_v12 = vld [vmem:[#allocation2 + $0x368] sm:$0xff]  }
  0x4b   :  { %1726 = vmatprep.subr.bf16.mxu1 %v1889_v13  ;;  %v1933_v13 = vld [vmem:[#allocation2 + $0x3b0] sm:$0xff]  }
  0x4d   :  { %1705 = vmatpush3.bf16.msra.mxu0 %v1890_v15  ;;  %v1936_v15 = vld [vmem:[#allocation2 + $0x328] sm:$0xff]  }
  0x4e   :  { %1734 = vmatprep.subr.bf16.mxu0 %v1893_v18  ;;  %1727 = vmatpush3.bf16.msra.mxu1 %v1891_v19  ;;  %v1939_v18 = vld [vmem:[#allocation2 + $0x3e0] sm:$0xff]  }
  0x4f   :  { %1756 = vmatprep.subr.bf16.mxu1 %v1894_v23  ;;  %v1940_v19 = vld [vmem:[#allocation2 + $0x320] sm:$0xff]   ;;  %v1944_v23 = vld [vmem:[#allocation2 + $0x318] sm:$0xff]  }
  0x50   :  { %1282 = vmatmul.mubr.bf16.vlgmr.msra.gmra.mxu0 %v126_v22  ;;  %v1943_v22 = vld [vmem:[#allocation2 + $0x3d8] sm:$0xff]  }
  0x51   :  { %1735 = vmatpush3.bf16.msra.mxu0 %v1895_v26  ;;  %1322 = vmatmul.mubr.bf16.vlgmr.msra.gmra.mxu1 %v128_v27  ;;  %v1947_v26 = vld [vmem:[#allocation2 + $0x3d0] sm:$0xff]  }
  0x52   :  { %1736 = vmatprep.subr.bf16.mxu0 %v1897_v28  ;;  %1757 = vmatpush3.bf16.msra.mxu1 %v1896_v30  ;;  %v1948_v27 = vld [vmem:[#allocation2 + $0x310] sm:$0xff]   ;;  %v1950_v28 = vld [vmem:[#allocation2 + $0x348] sm:$0xff]  }
  0x53   :  { %1758 = vmatprep.subr.bf16.mxu1 %v1898_v31  ;;  %1361 = vmatprep.mubr.bf16.mxu0 %v131_v3  ;;  %v1951_v30 = vld [vmem:[#allocation2 + $0x3c8] sm:$0xff]  }
  0x54   :  { %1401 = vmatprep.mubr.bf16.mxu1 %v133_v8  ;;  %v1952_v31 = vld [vmem:[#allocation2 + $0x308] sm:$0xff]  }
  0x55   :  { %1737 = vmatpush3.bf16.msra.mxu0 %v1899_v32  ;;  %v1954_v32 = vld [vmem:[#allocation2 + $0x340] sm:$0xff]  }
  0x56   :  { %1738 = vmatprep.subr.bf16.mxu0 %v1901_v33  ;;  %1759 = vmatpush3.bf16.msra.mxu1 %v1900_v34  ;;  %v1953_v33 = vld [vmem:[#allocation2 + $0x388] sm:$0xff]   ;;  %v1955_v34 = vld [vmem:[#allocation2 + $0x3c0] sm:$0xff]  }
  0x57   :  { %1760 = vmatprep.subr.bf16.mxu1 %v1902_v36  ;;  %v1956_v36 = vld [vmem:[#allocation2 + $0x300] sm:$0xff]  }
  0x59   :  { %1739 = vmatpush3.bf16.msra.mxu0 %v1903_v37  ;;  %v33_v37 = vld [vmem:[%s2063_s0 + $0x18] sm:$0xff] }
  0x5a   :  { %1740 = vmatprep.subr.bf16.mxu0 %v1905_v38  ;;  %1761 = vmatpush3.bf16.msra.mxu1 %v1904_v39  ;;  %v96_v38 = vrot.slane %v33_v37, %v2035_v35  ;;  %v89_v39 = vcombine.high %v33_v37, %v33_v37 }
  0x5b   :  { %1762 = vmatprep.subr.bf16.mxu1 %v1906_v40  ;;  %v1957_v40 = vld [vmem:[#allocation2 + $0x380] sm:$0xff]  }
  0x5d   :  { %1741 = vmatpush3.bf16.msra.mxu0 %v1907_v41  ;;  %v104_v41 = vcombine.high %v96_v38, %v96_v38 }
  0x5e   :  { %1742 = vmatprep.subr.bf16.mxu0 %v1909_v42  ;;  %1763 = vmatpush3.bf16.msra.mxu1 %v1908_v43  ;;  %v103_v42 = vrot.slane %v89_v39, %v2035_v35  ;;  %v134_v43 = vpack.c.bf16 %v96_v38, %v96_v38 }
  0x5f   :  { %1764 = vmatprep.subr.bf16.mxu1 %v1910_v44  ;;  %v135_v44 = vpack.c.bf16 %v104_v41, %v104_v41 }
  0x61   :  { %1743 = vmatpush3.bf16.msra.mxu0 %v1911_v45  ;;  %v105_v45 = vcombine.high %v103_v42, %v103_v42 }
  0x62   :  { %1744 = vmatprep.subr.bf16.mxu0 %v1913_v46  ;;  %1765 = vmatpush3.bf16.msra.mxu1 %v1912_v47  ;;  %v136_v46 = vpack.c.bf16 %v103_v42, %v103_v42 }
  0x63   :  { %1766 = vmatprep.subr.bf16.mxu1 %v1914_v48  ;;  %v137_v47 = vpack.c.bf16 %v105_v45, %v105_v45 }
  0x65   :  { %1745 = vmatpush3.bf16.msra.mxu0 %v1915_v49 }
  0x66   :  { %1746 = vmatprep.subr.bf16.mxu0 %v1917_v50  ;;  %1767 = vmatpush3.bf16.msra.mxu1 %v1916_v51  ;;  %v1517_v50 = vld [vmem:[%s2065_s2] ss:$0 sm:$0xff]  ;;  %s2011_s2 = smov [#allocation5]  }
  0x67   :  { %1768 = vmatprep.subr.bf16.mxu1 %v1918_v52  ;;  %s1508_s27 = sshll.u32 %s2011_s2, 4  ;;  %s1509_s27 = int_to_ptr.vmem [resolvable:$true] %s1508_s27 }
  0x68   :  { %s1983_s28 = scalar_lea.vmem %s1509_s27, 32  ;;  %p1988_p6 = scmp.lt.s32.totalorder %s1509_s27, %s1509_s27 }
  0x69   :  { %1747 = vmatpush3.bf16.msra.mxu0 %v1919_v53  ;;  %p1984_p5 = scmp.ne.s32.totalorder %s1509_s27, %s1983_s28  ;;  %p1989_p7 = scmp.lt.s32.totalorder %s1983_s28, %s1983_s28 }
  0x6a   :  { %1748 = vmatprep.subr.bf16.mxu0 %v1921_v54  ;;  %1769 = vmatpush3.bf16.msra.mxu1 %v1920_v55 }
  0x6b   :  { %1770 = vmatprep.subr.bf16.mxu1 %v1922_v56  ;;  %p1990_p8 = por %p1989_p7, %p1988_p6 }
  0x6d   :  { %1749 = vmatpush3.bf16.msra.mxu0 %v1923_v58  ;;  %p1991_p9 = pnand %p1990_p8, %p1984_p5 }
  0x6e   :  { %1778 = vmatprep.subr.bf16.mxu0 %v1926_v61  ;;  %1771 = vmatpush3.bf16.msra.mxu1 %v1924_v62 }
  0x6f   :  { %1800 = vmatprep.subr.bf16.mxu1 %v1927_v2 }
  0x70   :  { %1362 = vmatmul.mubr.bf16.vlgmr.msra.gmra.mxu0 %v130_v1 }
  0x71   :  { %1779 = vmatpush3.bf16.msra.mxu0 %v1928_v5  ;;  %1402 = vmatmul.mubr.bf16.vlgmr.msra.gmra.mxu1 %v132_v6 }
  0x72   :  { %1780 = vmatprep.subr.bf16.mxu0 %v1930_v7  ;;  %1801 = vmatpush3.bf16.msra.mxu1 %v1929_v9 }
  0x73   :  { %1802 = vmatprep.subr.bf16.mxu1 %v1931_v10  ;;  %1441 = vmatprep.mubr.bf16.mxu0 %v135_v44 }
  0x74   :  { %1481 = vmatprep.mubr.bf16.mxu1 %v137_v47 }
  0x75   :  { %1781 = vmatpush3.bf16.msra.mxu0 %v1932_v11 }
  0x76   :  { %1782 = vmatprep.subr.bf16.mxu0 %v1934_v12  ;;  %1803 = vmatpush3.bf16.msra.mxu1 %v1933_v13 }
  0x77   :  { %1804 = vmatprep.subr.bf16.mxu1 %v1935_v14 }
  0x79   :  { %1783 = vmatpush3.bf16.msra.mxu0 %v1936_v15 }
  0x7a   :  { %1784 = vmatprep.subr.bf16.mxu0 %v1938_v16  ;;  %1805 = vmatpush3.bf16.msra.mxu1 %v1937_v17 }
  0x7b   :  { %1806 = vmatprep.subr.bf16.mxu1 %v1939_v18 }
  0x7d   :  { %1785 = vmatpush3.bf16.msra.mxu0 %v1940_v19 }
  0x7e   :  { %1786 = vmatprep.subr.bf16.mxu0 %v1942_v20  ;;  %1807 = vmatpush3.bf16.msra.mxu1 %v1941_v21 }
  0x7f   :  { %1808 = vmatprep.subr.bf16.mxu1 %v1943_v22 }
  0x81   :  { %1787 = vmatpush3.bf16.msra.mxu0 %v1944_v23 }
  0x82   :  { %1788 = vmatprep.subr.bf16.mxu0 %v1946_v24  ;;  %1809 = vmatpush3.bf16.msra.mxu1 %v1945_v25 }
  0x83   :  { %1810 = vmatprep.subr.bf16.mxu1 %v1947_v26 }
  0x85   :  { %1789 = vmatpush3.bf16.msra.mxu0 %v1948_v27 }
  0x86   :  { %1790 = vmatprep.subr.bf16.mxu0 %v1950_v28  ;;  %1811 = vmatpush3.bf16.msra.mxu1 %v1949_v29 }
  0x87   :  { %1812 = vmatprep.subr.bf16.mxu1 %v1951_v30 }
  0x89   :  { %1791 = vmatpush3.bf16.msra.mxu0 %v1952_v31 }
  0x8a   :  { %1792 = vmatprep.subr.bf16.mxu0 %v1954_v32  ;;  %1813 = vmatpush3.bf16.msra.mxu1 %v1953_v33 }
  0x8b   :  { %1814 = vmatprep.subr.bf16.mxu1 %v1955_v34 }
  0x8d   :  { %1793 = vmatpush3.bf16.msra.mxu0 %v1956_v36 }
  0x8e   :  { %1815 = vmatpush3.bf16.msra.mxu1 %v1957_v40 }
  0x90   :  { %1442 = vmatmul.mubr.bf16.vlgmr.msra.gmra.mxu0 %v134_v43 }
  0x91   :  { %1482 = vmatmul.mubr.bf16.vlgmr.msra.gmra.mxu1 %v136_v46 }
  0xf0   :  { %v1662_v48 = vpop.f32.mrf.mxu0 }
  0xf1   :  { %v1684_v49 = vpop.f32.mrf.mxu1 }
  0xf2   :  { %v1663_v51 = vpop.f32.mrf.mxu0 }
  0xf3   :  { %v1664_v52 = vadd.f32 %v1663_v51, %v1662_v48  ;;  %v1685_v35 = vpop.f32.mrf.mxu1 }
  0xf4   :  { %v1665_v53 = vpop.f32.mrf.mxu0  ;;  %v1686_v55 = vadd.f32 %v1685_v35, %v1684_v49 }
  0xf5   :  { %v1204_v54 = vadd.f32 %v1664_v52, %v1517_v50  ;;  %v1687_v56 = vpop.f32.mrf.mxu1 }
  0xf6   :  { %v1666_v57 = vpop.f32.mrf.mxu0 }
  0xf7   :  { %v1244_v58 = vadd.f32 %v1686_v55, %v1204_v54  ;;  %v1688_v59 = vpop.f32.mrf.mxu1 }
 0x110   :  { %v1706_v60 = vpop.f32.mrf.mxu0 }
 0x111   :  { %v1728_v61 = vpop.f32.mrf.mxu1 }
 0x112   :  { %v1707_v62 = vpop.f32.mrf.mxu0 }
 0x113   :  { %v1729_v63 = vpop.f32.mrf.mxu1  ;;  %v1708_v12 = vadd.f32 %v1707_v62, %v1706_v60 }
 0x114   :  { %v1709_v0 = vpop.f32.mrf.mxu0  ;;  %v1730_v14 = vadd.f32 %v1729_v63, %v1728_v61 }
 0x115   :  { %v1731_v1 = vpop.f32.mrf.mxu1  ;;  %v1284_v13 = vadd.f32 %v1708_v12, %v1244_v58 }
 0x116   :  { %v1710_v2 = vpop.f32.mrf.mxu0 }
 0x117   :  { %v1732_v3 = vpop.f32.mrf.mxu1  ;;  %v1324_v16 = vadd.f32 %v1730_v14, %v1284_v13 }
 0x130   :  { %v1750_v4 = vpop.f32.mrf.mxu0 }
 0x131   :  { %v1772_v5 = vpop.f32.mrf.mxu1 }
 0x132   :  { %v1751_v6 = vpop.f32.mrf.mxu0 }
 0x133   :  { %v1773_v7 = vpop.f32.mrf.mxu1  ;;  %v1752_v15 = vadd.f32 %v1751_v6, %v1750_v4 }
 0x134   :  { %v1753_v8 = vpop.f32.mrf.mxu0  ;;  %v1774_v18 = vadd.f32 %v1773_v7, %v1772_v5 }
 0x135   :  { %v1775_v9 = vpop.f32.mrf.mxu1  ;;  %v1364_v17 = vadd.f32 %v1752_v15, %v1324_v16 }
 0x136   :  { %v1754_v10 = vpop.f32.mrf.mxu0 }
 0x137   :  { %v1776_v11 = vpop.f32.mrf.mxu1  ;;  %v1404_v22 = vadd.f32 %v1774_v18, %v1364_v17 }
 0x150   :  { %v1794_v19 = vpop.f32.mrf.mxu0 }
 0x151   :  { %v1816_v20 = vpop.f32.mrf.mxu1 }
 0x152   :  { %v1795_v21 = vpop.f32.mrf.mxu0 }
 0x153   :  { %v1796_v23 = vadd.f32 %v1795_v21, %v1794_v19  ;;  %v1817_v24 = vpop.f32.mrf.mxu1 }
 0x154   :  { %v1797_v25 = vpop.f32.mrf.mxu0  ;;  %v1818_v27 = vadd.f32 %v1817_v24, %v1816_v20 }
 0x155   :  { %v1444_v26 = vadd.f32 %v1796_v23, %v1404_v22  ;;  %v1819_v28 = vpop.f32.mrf.mxu1 }
 0x156   :  { %v1798_v29 = vpop.f32.mrf.mxu0 }
 0x157   :  { %v1484_v30 = vadd.f32 %v1818_v27, %v1444_v26  ;;  %v1820_v31 = vpop.f32.mrf.mxu1 }
 0x159   :  { %v1490_v32 = vsel %vm1489_vm0, %v1484_v30, -inf }
 0x15a   :  { %1491 = vmax.xlane.f32.xlu0 %v1490_v32 }
 0x1e3   :  { %v1492_v33 = vpop.xlane.xlu0 %1491 }
 0x1e4   :  { %v1493_v34 = vsub.f32 %v1484_v30, %v1492_v33 }
 0x1e6   :  { %v1494_v36 = vmul.f32 1.442695, %v1493_v34 }
 0x1e8   :  { %1959 = vpow2.f32 %v1494_v36 }
 0x1f5   :  { %v1960_v37 = vpop.eup %1959 }
 0x1f6   :  { %v1496_v38 = vsel %vm1489_vm0, %v1960_v37, 0.0 }
 0x1f7   :  { %1497 = vadd.xlane.f32.xlu0 %v1496_v38 }
 0x280   :  { %v1498_v39 = vpop.xlane.xlu0 %1497 }
 0x281   :  { %1961 = vrcp.f32 %v1498_v39 }
 0x28e   :  { %v1962_v40 = vpop.eup %1961 }
 0x28f   :  { %v1500_v41 = vmul.f32 %v1962_v40, %v1960_v37 }
 0x291   :  { %1501 = vst [vmem:[#allocation5] sm:$0x3] %v1500_v41 }
 0x292   :  { %1994 = shalt.err (!%p1991_p9)
}
 0x293   :  { %1511 = dma.vmem_to_hbm [thread:$0]  %s1509_s27, 32, %s2066_s3, [#allocation4]  }
 0x294   :  { %2005 = dma.done.wait [#allocation4], 32  }
 0x295   :  { %2006 = vsyncadd [#allocation4], 4294967264 }
 0x296   :  { %1515 = vsyncpa [#allocation3], 1 }
 0x297   :  { %1516 = vsyncpa [#allocation4], 1 }

</bundles_post_ra>
